<compile_context>
chip_gen: v6e
topology: v6e:2x2x1
jax: 0.10.0
libtpu: 0.0.40
codegen_flags: <defaults>
</compile_context>

<pallas_src>
import functools

import jax
import jax.numpy as jnp
from jax.experimental import pallas as pl
from jax.experimental.pallas import tpu as pltpu  # noqa: F401  (TPU backend)

# ----------------------------------------------------------------------------
# Hyper-parameters (small, consistent with the module's __init__ signature)
# ----------------------------------------------------------------------------
BATCH = 8
AR_EMBED = 32          # autoregressive_embedding_size
ORIG_256 = 256         # original_256
ORIG_128 = 128         # original_128
ORIG_64 = 64           # original_64
LOCATION_DIM = 256     # location_dim
TEMPERATURE = 0.8      # AHP.temperature
MASK_FILL = -1.0e9     # masked_fill value (before /temperature folding)


# ----------------------------------------------------------------------------
# Pallas kernel: fused (collapsed) linear + in-kernel mask + log-softmax
# ----------------------------------------------------------------------------
def _location_head_kernel(x_ref, w_ref, b_ref, nv_ref, logp_ref, *, mask_fill):
    # Single fused GEMM: fc_1..fc_4 collapsed offline, 1/T pre-folded into w/b.
    # bf16 operands, f32 accumulation on the MXU.
    x = x_ref[...].astype(jnp.bfloat16)
    y = jnp.dot(x, w_ref[...], preferred_element_type=jnp.float32) + b_ref[...]

    # masked_fill(~mask, -1e9) then /T, with the mask rebuilt in-kernel from
    # the per-row valid-prefix length (no [B, L] mask DMA). mask_fill is
    # already divided by temperature.
    col = jax.lax.broadcasted_iota(jnp.int32, y.shape, dimension=1)
    logits = jnp.where(col < nv_ref[...], y, jnp.float32(mask_fill))

    # Numerically stable log-softmax; sampling + log_prob consume log-probs,
    # so no exp/reciprocal/probs output or extra HBM round-trip is needed.
    m = jnp.max(logits, axis=-1, keepdims=True)
    z = logits - m
    lse = jnp.log(jnp.sum(jnp.exp(z), axis=-1, keepdims=True))
    logp_ref[...] = z - lse


def location_head_logp(x, w_eff, b_eff, num_valid, temperature=TEMPERATURE):
    """Fused Pallas kernel -> normalized log-probs over locations, [B, L] f32."""
    B = x.shape[0]
    L = w_eff.shape[1]

    def full_spec(shape):
        return pl.BlockSpec(shape, lambda: (0,) * len(shape))

    kernel = functools.partial(_location_head_kernel,
                               mask_fill=MASK_FILL / temperature)
    args = (x, w_eff, b_eff, num_valid)
    # B=8 fits trivially in one invocation (working set << VMEM).  If batch
    # grows, add a grid over batch rows with
    # compiler_params=pltpu.CompilerParams(dimension_semantics=("parallel",))
    # so work shards across both v7x TensorCores.
    return pl.pallas_call(
        kernel,
        out_shape=jax.ShapeDtypeStruct((B, L), jnp.float32),
        in_specs=[full_spec(a.shape) for a in args],
        out_specs=full_spec((B, L)),
    )(*args)


# ----------------------------------------------------------------------------
# Parameters: PyTorch-Linear-style per-layer weights + host-side fusion
# ----------------------------------------------------------------------------
def init_params(key):
    """Deterministic synthetic weights (PyTorch Linear shapes, stored [in, out])."""
    dims = [(AR_EMBED, ORIG_256), (ORIG_256, ORIG_128),
            (ORIG_128, ORIG_64), (ORIG_64, LOCATION_DIM)]
    params = []
    for (din, dout) in dims:
        key, kw, kb = jax.random.split(key, 3)
        bound = 1.0 / jnp.sqrt(din)
        w = jax.random.uniform(kw, (din, dout), jnp.float32, -bound, bound)
        b = jax.random.uniform(kb, (1, dout), jnp.float32, -bound, bound)
        params += [w, b]
    return params


def fuse_params(params, temperature=TEMPERATURE):
    """Collapse the 4 bias-only linear layers into one and fold in 1/T.

    Exact algebraically (no activation between layers); done once on the host
    so per-call weight traffic is a single bf16 [32, 256] + f32 [1, 256].
    """
    w1, b1, w2, b2, w3, b3, w4, b4 = params
    w_eff = w1 @ w2 @ w3 @ w4                             # [32, 256], f32
    b_eff = ((b1 @ w2 + b2) @ w3 + b3) @ w4 + b4          # [1, 256],  f32
    inv_t = jnp.float32(1.0 / temperature)
    w_eff = (w_eff * inv_t).astype(jnp.bfloat16)
    b_eff = (b_eff * inv_t).astype(jnp.float32)
    return w_eff, b_eff


# ----------------------------------------------------------------------------
# Glue: mask lengths, sampling, log-prob reduction
# ----------------------------------------------------------------------------
def generate_num_valid(level1_action, location_dim=LOCATION_DIM):
    # TODO(synk): generate_location_mask is not defined in the reference code;
    # use a deterministic synthetic prefix mask (valid length depends on
    # level1_action) so the masked_fill semantics are exercised.
    num_valid = (level1_action % location_dim) + 1        # [B]
    return num_valid.astype(jnp.int32).reshape(-1, 1)     # [B, 1]


def location_head_forward(autoregressive_embedding, level1_action, fused,
                          sample_key, temperature=TEMPERATURE):
    batch_size = level1_action.shape[0]
    w_eff, b_eff = fused
    num_valid = generate_num_valid(level1_action)

    # hot path: single fused GEMM + mask + temperature + log-softmax in-kernel
    logp = location_head_logp(autoregressive_embedding, w_eff, b_eff,
                              num_valid, temperature=temperature)   # [B, L]

    # dist.sample() — categorical over normalized log-probs
    location_id = jax.random.categorical(sample_key, logp, axis=-1)  # [B]
    location_id = location_id.reshape(batch_size, -1)                # [B, 1]

    # dist.log_prob(location_id) with PyTorch Categorical broadcasting:
    # value [B,1] vs batch_shape [B] -> [B,B]; then .view(B,-1).sum(-1) sums
    # each sampled id's log-prob across every batch distribution.
    lp_matrix = jnp.take(logp, location_id[:, 0], axis=1)  # [B(dist j), B(id i)]
    location_probs = jnp.sum(lp_matrix, axis=0)[:, None]   # [B, 1]

    return location_probs, location_id


def _reference_logp(x, params, level1_action, temperature=TEMPERATURE):
    """Pure-JAX, un-fused f32 mirror of the PyTorch forward (for validation)."""
    w1, b1, w2, b2, w3, b3, w4, b4 = params
    h = x @ w1 + b1
    h = h @ w2 + b2
    h = h @ w3 + b3
    y = h @ w4 + b4
    num_valid = (level1_action % LOCATION_DIM) + 1
    mask = jnp.arange(LOCATION_DIM)[None, :] < num_valid[:, None]
    logits = jnp.where(mask, y, jnp.float32(MASK_FILL)) / temperature
    return jax.nn.log_softmax(logits, axis=-1)


# ----------------------------------------------------------------------------
# Main
# ----------------------------------------------------------------------------
if __name__ == "__main__":
    root = jax.random.PRNGKey(0)
    k_params, k_x, k_act, k_sample = jax.random.split(root, 4)

    params = init_params(k_params)
    fused = fuse_params(params)                      # host-side, once per model
    autoregressive_embedding = jax.random.normal(
        k_x, (BATCH, AR_EMBED), dtype=jnp.float32)
    level1_action = jax.random.randint(
        k_act, (BATCH,), minval=0, maxval=10, dtype=jnp.int32)

    fwd = jax.jit(location_head_forward)
    location_probs, location_id = fwd(
        autoregressive_embedding, level1_action, fused, k_sample)
    jax.block_until_ready((location_probs, location_id))

    # Validate the fused bf16 kernel against the un-fused f32 reference.
    logp = location_head_logp(autoregressive_embedding, fused[0], fused[1],
                              generate_num_valid(level1_action))
    ref_logp = _reference_logp(autoregressive_embedding, params, level1_action)
    max_err = float(jnp.max(jnp.abs(logp - ref_logp) / (jnp.abs(ref_logp) + 1.0)))
    assert max_err < 5e-2, f"fused kernel mismatch vs reference: {max_err}"

    assert location_probs.shape == (BATCH, 1)
    assert location_id.shape == (BATCH, 1)
    print("KERNEL_OK")
</pallas_src>

<mosaic_0001>
module attributes {stable_mosaic.version = 11 : i64} {
  func.func @_location_head_kernel(%arg0: memref<8x32xf32, #tpu.memory_space<vmem>>, %arg1: memref<32x256xbf16, #tpu.memory_space<vmem>>, %arg2: memref<1x256xf32, #tpu.memory_space<vmem>>, %arg3: memref<8x1xi32, #tpu.memory_space<vmem>>, %arg4: memref<8x256xf32, #tpu.memory_space<vmem>>) attributes {dimension_semantics = [], scalar_prefetch = 0 : i64, scratch_operands = 0 : i64, tpu.core_type = #tpu.core_type<tc>} {
    %c0 = arith.constant 0 : index
    %c0_0 = arith.constant 0 : index
    %0 = vector.load %arg0[%c0, %c0_0] : memref<8x32xf32, #tpu.memory_space<vmem>>, vector<8x32xf32>
    %1 = arith.truncf %0 : vector<8x32xf32> to vector<8x32xbf16>
    %c0_1 = arith.constant 0 : index
    %c0_2 = arith.constant 0 : index
    %2 = vector.load %arg1[%c0_1, %c0_2] : memref<32x256xbf16, #tpu.memory_space<vmem>>, vector<32x256xbf16>
    %cst = arith.constant dense<0.000000e+00> : vector<8x256xf32>
    %3 = tpu.matmul %1, %2, %cst {dimension_numbers = #tpu.dot_dimension_numbers<[1], [0], [0], [1], [0, 0, 1, 1], [], []>} : vector<8x32xbf16>, vector<32x256xbf16>, vector<8x256xf32> -> vector<8x256xf32>
    %c0_3 = arith.constant 0 : index
    %c0_4 = arith.constant 0 : index
    %4 = vector.load %arg2[%c0_3, %c0_4] : memref<1x256xf32, #tpu.memory_space<vmem>>, vector<1x256xf32>
    %5 = vector.broadcast %4 : vector<1x256xf32> to vector<8x256xf32>
    %6 = arith.addf %3, %5 : vector<8x256xf32>
    %7 = tpu.iota {dimensions = array<i32: 1>} : vector<8x256xi32>
    %c0_5 = arith.constant 0 : index
    %c0_6 = arith.constant 0 : index
    %8 = vector.load %arg3[%c0_5, %c0_6] : memref<8x1xi32, #tpu.memory_space<vmem>>, vector<8x1xi32>
    %9 = vector.broadcast %8 : vector<8x1xi32> to vector<8x256xi32>
    %10 = arith.cmpi slt, %7, %9 : vector<8x256xi32>
    %cst_7 = arith.constant -1.250000e+09 : f32
    %11 = vector.broadcast %cst_7 : f32 to vector<8x256xf32>
    %12 = arith.select %10, %6, %11 : vector<8x256xi1>, vector<8x256xf32>
    %cst_8 = arith.constant dense<0xFF800000> : vector<8xf32>
    %13 = vector.multi_reduction <maximumf>, %12, %cst_8 [1] : vector<8x256xf32> to vector<8xf32>
    %14 = vector.shape_cast %13 : vector<8xf32> to vector<8x1xf32>
    %15 = vector.broadcast %14 : vector<8x1xf32> to vector<8x256xf32>
    %16 = arith.subf %12, %15 : vector<8x256xf32>
    %17 = math.exp %16 : vector<8x256xf32>
    %cst_9 = arith.constant dense<0.000000e+00> : vector<8xf32>
    %18 = vector.multi_reduction <add>, %17, %cst_9 [1] : vector<8x256xf32> to vector<8xf32>
    %19 = vector.shape_cast %18 : vector<8xf32> to vector<8x1xf32>
    %20 = math.log %19 : vector<8x1xf32>
    %21 = vector.broadcast %20 : vector<8x1xf32> to vector<8x256xf32>
    %22 = arith.subf %16, %21 : vector<8x256xf32>
    %c0_10 = arith.constant 0 : index
    %c0_11 = arith.constant 0 : index
    %23 = vector.load %arg4[%c0_10, %c0_11] : memref<8x256xf32, #tpu.memory_space<vmem>>, vector<8x256xf32>
    tpu.vector_store %arg4[%c0_10, %c0_11], %22 {strides = array<i32>} : memref<8x256xf32, #tpu.memory_space<vmem>>, vector<8x256xf32>,
    return
  }
}

</mosaic_0001>

<bundles_post_ra>
// kernel: location_head_forward.1
= control target key start
LH: loop header
LB: loop body
LE: loop exit
PB: predicated region body
PF: predicated region fallthrough
CT: control target
= control target key end

     0   :  { %9 = vsyncpa [#allocation3], 0  ;;  %s193_s15 = smov [#allocation2]   ;;  %s240_s0 = inlined_call_operand.vmem [shape: f32[8,32], index: 0, kind: input, shape index: {}]   ;;  %s241_s1 = inlined_call_operand.hbm [shape: bf16[32,256], index: 1, kind: input, shape index: {}]   ;;  %s242_s2 = inlined_call_operand.vmem [shape: f32[1,256], index: 2, kind: input, shape index: {}]   ;;  %s243_s3 = inlined_call_operand.vmem [shape: s32[8,1], index: 3, kind: input, shape index: {}]   ;;  %s244_s4 = inlined_call_operand.vmem [shape: f32[8,256], index: 4, kind: output, shape index: {}]  }
   0x1   :  { %s17_s16 = sshll.u32 %s193_s15, 4  ;;  %s18_s16 = int_to_ptr.vmem [resolvable:$true] %s17_s16 }
   0x2   :  { %s179_s17 = scalar_lea.vmem %s18_s16, 512  ;;  %p184_p1 = scmp.lt.s32.totalorder %s18_s16, %s18_s16 }
   0x3   :  { %p180_p0 = scmp.ne.s32.totalorder %s18_s16, %s179_s17  ;;  %p185_p2 = scmp.lt.s32.totalorder %s179_s17, %s179_s17 }
   0x5   :  { %p186_p3 = por %p185_p2, %p184_p1 }
   0x7   :  { %p187_p4 = pnand %p186_p3, %p180_p0 }
   0x9   :  { %190 = shalt.err (!%p187_p4)
}
   0xa   :  { %s194_s18 = smov 128   ;;  %s195_s19 = smov 8  }
   0xb   :  { %23 = dma.hbm_to_vmem [thread:$0]  %s241_s1, 512, %s18_s16, [#allocation3], %s194_s18, %s194_s18, %s195_s19  }
   0xc   :  { %191 = dma.done.wait [#allocation3], 512  }
   0xd   :  { %192 = vsyncadd [#allocation3], 4294966784  ;;  %v196_v0 = vmov 0   ;;  %v159_v1 = vld [vmem:[#allocation2 + $0x14] ss:$8 sps:$4 sm:$0xff]   ;;  %v32_v5 = vld [vmem:[%s240_s0] sm:$0xff]  ;;  %v40_v8 = vlaneseq }
   0xe   :  { %106 = vmatprep.mubr.bf16.mxu0 %v196_v0  ;;  %158 = vset.pattern.permute.xlu0 %v196_v0  ;;  %v161_v2 = vld [vmem:[#allocation2 + $0x10] ss:$8 sps:$4 sm:$0xff]   ;;  %v162_v3 = vld [vmem:[#allocation2 + $0x4] ss:$8 sps:$4 sm:$0xff]   ;;  %v164_v4 = vld [vmem:[#allocation2] ss:$8 sps:$4 sm:$0xff]   ;;  %v33_v7 = vpack.c.bf16 %v32_v5, %v32_v5 }
   0xf   :  { %86 = vmatprep.subr.bf16.mxu0 %v159_v1  ;;  %v118_v6 = vld [vmem:[%s243_s3] sm:$0xff]  ;;  %vm70_vm0 = vcmask 261120   ;;  %v41_v9 = vshrl.u32 %v40_v8, 7  ;;  %v116_v12 = vand.u32 127, %v40_v8 }
  0x10   :  { %87 = vmatpush1.bf16.msra.mxu0 %v161_v2  ;;  %120 = vperm.xlu0 %158, %v118_v6   ;;  %v38_v11 = vld [vmem:[%s242_s2] sm:$0x3] }
  0x11   :  { %88 = vmatprep.subr.bf16.mxu0 %v162_v3  ;;  %v42_v10 = vsub.s32 0, %v41_v9  ;;  %v46_v13 = vsub.s32 1, %v41_v9  ;;  %v117_v15 = vadd.s32 128, %v116_v12 }
  0x13   :  { %v43_v14 = vrot.slane %v38_v11, %v42_v10  ;;  %v47_v17 = vrot.slane %v38_v11, %v46_v13 }
  0x14   :  { %89 = vmatpush1.bf16.msra.mxu0 %v164_v4 }
  0x17   :  { %153 = vmatmul.mubr.msk.bf16.vlgmr.msra.gmra.mxu0 %vm70_vm0, %v33_v7 }
  0x8b   :  { %v121_v16 = vpop.permute.xlu0 %120 }
  0x8c   :  { %vm122_vm1 = vcmp.lt.s32.totalorder %v116_v12, %v121_v16  ;;  %vm123_vm2 = vcmp.lt.s32.totalorder %v117_v15, %v121_v16 }
  0xd7   :  { %v108_v18 = vpop.f32.mrf.mxu0 }
  0xd8   :  { %v109_v19 = vadd.f32 %v108_v18, %v43_v14 }
  0xd9   :  { %v110_v20 = vpop.f32.mrf.mxu0 }
  0xda   :  { %v111_v21 = vadd.f32 %v110_v20, %v47_v17  ;;  %v124_v23 = vsel %vm122_vm1, %v109_v19, -1.25e+09 }
  0xdb   :  { %v112_v22 = vpop.f32.mrf.mxu0 }
  0xdc   :  { %v125_v24 = vsel %vm123_vm2, %v111_v21, -1.25e+09 }
  0xdd   :  { %v113_v25 = vpop.f32.mrf.mxu0  ;;  %v126_v26 = vmax.f32 %v124_v23, %v125_v24 }
  0xdf   :  { %127 = vmax.xlane.f32.xlu0 %v126_v26 }
 0x168   :  { %v128_v27 = vpop.xlane.xlu0 %127 }
 0x169   :  { %v129_v28 = vsub.f32 %v124_v23, %v128_v27  ;;  %v130_v29 = vsub.f32 %v125_v24, %v128_v27 }
 0x16b   :  { %v131_v30 = vmul.f32 1.442695, %v129_v28  ;;  %v133_v31 = vmul.f32 1.442695, %v130_v29 }
 0x16d   :  { %165 = vpow2.f32 %v131_v30 }
 0x16e   :  { %167 = vpow2.f32 %v133_v31 }
 0x17a   :  { %v166_v32 = vpop.eup %165 }
 0x17b   :  { %v168_v33 = vpop.eup %167 }
 0x17c   :  { %v135_v34 = vadd.f32 %v168_v33, %v166_v32 }
 0x17e   :  { %136 = vadd.xlane.f32.xlu1 %v135_v34 }
 0x207   :  { %v137_v35 = vpop.xlane.xlu1 %136 }
 0x208   :  { %169 = vlog2.f32 %v137_v35 }
 0x215   :  { %v170_v36 = vpop.eup %169 }
 0x216   :  { %v139_v37 = vmul.f32 0.6931472, %v170_v36 }
 0x218   :  { %v140_v38 = vsub.f32 %v129_v28, %v139_v37  ;;  %v141_v39 = vsub.f32 %v130_v29, %v139_v37 }
 0x21a   :  { %142 = vst [vmem:[%s244_s4] sm:$0xff] %v140_v38  ;;  %143 = vst [vmem:[%s244_s4 + $0x8] sm:$0xff] %v141_v39 }
 0x21b   :  { %148 = vsyncpa [#allocation3], 1 }

</bundles_post_ra>
